<compile_context>
chip_gen: v6e
topology: v6e:2x2x1
jax: 0.10.0
libtpu: 0.0.40
codegen_flags: <defaults>
</compile_context>

<pallas_src>
import jax
import jax.numpy as jnp
from jax.experimental import pallas as pl
from jax.experimental.pallas import tpu as pltpu


IN_F = 4       # logical decoder input features
IN_PAD = 8     # K dim padded to a sublane multiple (exact zero padding)
HIDDEN = 100   # logical hidden width
OUT_F = 2      # decoder output features
PAD = 128      # lane-dense padded hidden width


def _round_up(n, m):
    return ((n + m - 1) // m) * m


def decoder_kernel(x_ref, w1_ref, b1_ref, w2_ref, b2_ref,
                   w3_ref, b3_ref, w4_ref, b4_ref, o_ref):
    # x tile: (tb, 8) f32.  Weights f32, padded to 128-lane widths; biases f32.
    # Weight/bias refs are read inside each dot so operands stream from VMEM
    # with short live ranges (avoids vreg spills).
    x = x_ref[...]
    h = jnp.dot(x, w1_ref[...], preferred_element_type=jnp.float32) + b1_ref[...]
    h = jnp.maximum(h, 0.0)
    h = jnp.dot(h, w2_ref[...], preferred_element_type=jnp.float32) + b2_ref[...]
    h = jnp.maximum(h, 0.0)
    h = jnp.dot(h, w3_ref[...], preferred_element_type=jnp.float32) + b3_ref[...]
    h = jnp.maximum(h, 0.0)
    out = jnp.dot(h, w4_ref[...], preferred_element_type=jnp.float32) + b4_ref[...]
    # Store only the live 2 output lanes; the HBM tile is (tb, 2) f32.
    o_ref[...] = out[:, :OUT_F].astype(o_ref.dtype)


def _xla_forward(x, p):
    """Plain-XLA path with the same padded params (small-batch fast path)."""
    x8 = jnp.pad(x, ((0, 0), (0, IN_PAD - x.shape[1])))
    h = jnp.maximum(x8 @ p["w1"] + p["b1"], 0.0)
    h = jnp.maximum(h @ p["w2"] + p["b2"], 0.0)
    h = jnp.maximum(h @ p["w3"] + p["b3"], 0.0)
    return (h @ p["w4"] + p["b4"])[:, :OUT_F]


def decoder_forward(x, params, *, block_rows=2048, min_pallas_rows=512):
    """x: (B, 4) float32. params: output of prepare_params(). Returns (B, 2) f32.

    block_rows: batch tile size (rounded to a multiple of 8). 2048 keeps the
    streamed (tb, 8)-in / (tb, 2)-out tiles large enough to amortize per-step
    grid overhead while double-buffered activation tiles stay at a few KB.
    min_pallas_rows: batches smaller than this skip pallas_call (launch + grid
    overhead dominates tiny batches) and use a plain XLA path instead.
    """
    B = x.shape[0]
    if B < min_pallas_rows:
        return _xla_forward(x, params)

    w1, b1, w2, b2, w3, b3, w4, b4 = (
        params["w1"], params["b1"], params["w2"], params["b2"],
        params["w3"], params["b3"], params["w4"], params["b4"],
    )

    # Zero-pad K: 4 -> 8 (exact; padded weight rows are zero).
    x = jnp.pad(x, ((0, 0), (0, IN_PAD - IN_F)))

    # Batch tile: multiple of 8, capped so the grid has >= 2 steps whenever the
    # batch allows it (lets v7x megacore split the "parallel" axis).
    b8 = _round_up(B, 8)
    tb = max(8, min(_round_up(block_rows, 8), _round_up(pl.cdiv(b8, 2), 8)))
    b_pad = _round_up(B, tb)
    if b_pad != B:
        x = jnp.pad(x, ((0, b_pad - B), (0, 0)))
    grid = (b_pad // tb,)

    # Weights / biases: full-array blocks with constant index_map -> DMA'd to
    # VMEM once and held resident across the whole batch grid.
    def resident(a):
        return pl.BlockSpec(a.shape, lambda i: (0,) * a.ndim)

    param_bytes = sum(int(p.size) * p.dtype.itemsize
                      for p in (w1, b1, w2, b2, w3, b3, w4, b4))
    flops = 2 * b_pad * (IN_PAD * PAD + 3 * PAD * PAD)
    bytes_accessed = (b_pad * IN_PAD * 4          # streamed input (padded K)
                      + b_pad * OUT_F * 4         # streamed narrow output
                      + param_bytes)

    out = pl.pallas_call(
        decoder_kernel,
        out_shape=jax.ShapeDtypeStruct((b_pad, OUT_F), jnp.float32),
        grid=grid,
        in_specs=[pl.BlockSpec((tb, IN_PAD), lambda i: (i, 0)),
                  resident(w1), resident(b1),
                  resident(w2), resident(b2),
                  resident(w3), resident(b3),
                  resident(w4), resident(b4)],
        out_specs=pl.BlockSpec((tb, OUT_F), lambda i: (i, 0)),
        compiler_params=pltpu.CompilerParams(
            dimension_semantics=("parallel",)),
        cost_estimate=pl.CostEstimate(
            flops=flops, transcendentals=0, bytes_accessed=bytes_accessed),
    )(x, w1, b1, w2, b2, w3, b3, w4, b4)

    return out[:B] if b_pad != B else out


def init_params(key):
    """Deterministic synthetic weights matching the nn.Linear shapes.

    Stored already transposed to (in, out); biases kept 2-D (1, out) so they
    broadcast cleanly on the TPU lane axis.  Values are float32 (un-padded).
    """
    ks = jax.random.split(key, 8)

    def linear(kw, kb, fan_in, fan_out):
        bound = 1.0 / jnp.sqrt(fan_in)
        w = jax.random.uniform(kw, (fan_in, fan_out), jnp.float32, -bound, bound)
        b = jax.random.uniform(kb, (1, fan_out), jnp.float32, -bound, bound)
        return w, b

    w1, b1 = linear(ks[0], ks[1], IN_F, HIDDEN)
    w2, b2 = linear(ks[2], ks[3], HIDDEN, HIDDEN)
    w3, b3 = linear(ks[4], ks[5], HIDDEN, HIDDEN)
    w4, b4 = linear(ks[6], ks[7], HIDDEN, OUT_F)
    return {"w1": w1, "b1": b1, "w2": w2, "b2": b2,
            "w3": w3, "b3": b3, "w4": w4, "b4": b4}


def prepare_params(p):
    """Zero-pad feature dims (hidden -> 128, first-layer K -> 8, output -> 128).

    Weights stay f32 for close parity with the f32 PyTorch Decoder (compute is
    not the bottleneck).  Padding is exact: padded lanes/rows see zero weights
    and zero bias, stay zero through ReLU, and are sliced away at the store.
    """
    def pad_w(w, rows, cols):
        out = jnp.zeros((rows, cols), jnp.float32)
        return out.at[:w.shape[0], :w.shape[1]].set(w)

    def pad_b(b, cols):
        out = jnp.zeros((1, cols), jnp.float32)
        return out.at[:, :b.shape[1]].set(b)

    return {
        "w1": pad_w(p["w1"], IN_PAD, PAD), "b1": pad_b(p["b1"], PAD),
        "w2": pad_w(p["w2"], PAD, PAD),    "b2": pad_b(p["b2"], PAD),
        "w3": pad_w(p["w3"], PAD, PAD),    "b3": pad_b(p["b3"], PAD),
        "w4": pad_w(p["w4"], PAD, PAD),    "b4": pad_b(p["b4"], PAD),
    }


def reference_forward_f32(x, p):
    """Pure-f32 reference matching the PyTorch Decoder forward."""
    h = jnp.maximum(x @ p["w1"] + p["b1"], 0.0)
    h = jnp.maximum(h @ p["w2"] + p["b2"], 0.0)
    h = jnp.maximum(h @ p["w3"] + p["b3"], 0.0)
    return h @ p["w4"] + p["b4"]


if __name__ == "__main__":
    key = jax.random.PRNGKey(0)
    k_param, k_x = jax.random.split(key)

    params_f32 = init_params(k_param)
    params = prepare_params(params_f32)

    B = 37  # deliberately not a multiple of the tile: exercises batch padding
    x = jax.random.normal(k_x, (B, IN_F), jnp.float32)

    # Small tile + min_pallas_rows=0 so the demo exercises a multi-step batch
    # grid through the Pallas path (production default is block_rows=2048 with
    # the small-batch fast path enabled).
    out = decoder_forward(x, params, block_rows=16, min_pallas_rows=0)
    out = jax.block_until_ready(out)
    assert out.shape == (B, OUT_F), out.shape

    # f32 reference (PyTorch-equivalent numerics). Tolerance covers MXU f32
    # matmul pass rounding.
    ref = reference_forward_f32(x, params_f32)
    assert jnp.allclose(out, ref, atol=2e-2, rtol=2e-2), \
        f"max abs err {float(jnp.max(jnp.abs(out - ref)))}"

    # Small-batch fast path (plain XLA) agrees with the kernel path.
    out_fast = jax.block_until_ready(decoder_forward(x, params))
    assert out_fast.shape == (B, OUT_F)
    assert jnp.allclose(out_fast, out, atol=2e-2, rtol=2e-2)

    print("KERNEL_OK")
</pallas_src>

<mosaic_0001>
module attributes {stable_mosaic.version = 11 : i64} {
  func.func @decoder_kernel(%arg0: i32, %arg1: memref<16x8xf32, #tpu.memory_space<vmem>>, %arg2: memref<8x128xf32, #tpu.memory_space<vmem>>, %arg3: memref<1x128xf32, #tpu.memory_space<vmem>>, %arg4: memref<128x128xf32, #tpu.memory_space<vmem>>, %arg5: memref<1x128xf32, #tpu.memory_space<vmem>>, %arg6: memref<128x128xf32, #tpu.memory_space<vmem>>, %arg7: memref<1x128xf32, #tpu.memory_space<vmem>>, %arg8: memref<128x128xf32, #tpu.memory_space<vmem>>, %arg9: memref<1x128xf32, #tpu.memory_space<vmem>>, %arg10: memref<16x2xf32, #tpu.memory_space<vmem>>) attributes {dimension_semantics = [#tpu.dimension_semantics<parallel>], iteration_bounds = array<i64: 3>, scalar_prefetch = 0 : i64, scratch_operands = 0 : i64, tpu.core_type = #tpu.core_type<tc>, window_params = [{transform_indices = @transform_0, window_bounds = array<i64: 16, 8>}, {pipeline_mode = #tpu.pipeline_mode<synchronous>, transform_indices = @transform_1, window_bounds = array<i64: 8, 128>}, {pipeline_mode = #tpu.pipeline_mode<synchronous>, transform_indices = @transform_2, window_bounds = array<i64: 1, 128>}, {pipeline_mode = #tpu.pipeline_mode<synchronous>, transform_indices = @transform_3, window_bounds = array<i64: 128, 128>}, {pipeline_mode = #tpu.pipeline_mode<synchronous>, transform_indices = @transform_4, window_bounds = array<i64: 1, 128>}, {pipeline_mode = #tpu.pipeline_mode<synchronous>, transform_indices = @transform_5, window_bounds = array<i64: 128, 128>}, {pipeline_mode = #tpu.pipeline_mode<synchronous>, transform_indices = @transform_6, window_bounds = array<i64: 1, 128>}, {pipeline_mode = #tpu.pipeline_mode<synchronous>, transform_indices = @transform_7, window_bounds = array<i64: 128, 128>}, {pipeline_mode = #tpu.pipeline_mode<synchronous>, transform_indices = @transform_8, window_bounds = array<i64: 1, 128>}, {transform_indices = @transform_9, window_bounds = array<i64: 16, 2>}]} {
    %c0 = arith.constant 0 : index
    %c0_0 = arith.constant 0 : index
    %0 = vector.load %arg1[%c0, %c0_0] : memref<16x8xf32, #tpu.memory_space<vmem>>, vector<16x8xf32>
    %c0_1 = arith.constant 0 : index
    %c0_2 = arith.constant 0 : index
    %1 = vector.load %arg2[%c0_1, %c0_2] : memref<8x128xf32, #tpu.memory_space<vmem>>, vector<8x128xf32>
    %cst = arith.constant dense<0.000000e+00> : vector<16x128xf32>
    %2 = tpu.matmul %0, %1, %cst {dimension_numbers = #tpu.dot_dimension_numbers<[1], [0], [0], [1], [0, 0, 1, 1], [], []>} : vector<16x8xf32>, vector<8x128xf32>, vector<16x128xf32> -> vector<16x128xf32>
    %c0_3 = arith.constant 0 : index
    %c0_4 = arith.constant 0 : index
    %3 = vector.load %arg3[%c0_3, %c0_4] : memref<1x128xf32, #tpu.memory_space<vmem>>, vector<1x128xf32>
    %4 = vector.broadcast %3 : vector<1x128xf32> to vector<16x128xf32>
    %5 = arith.addf %2, %4 : vector<16x128xf32>
    %cst_5 = arith.constant 0.000000e+00 : f32
    %6 = vector.broadcast %cst_5 : f32 to vector<16x128xf32>
    %7 = arith.maximumf %5, %6 : vector<16x128xf32>
    %c0_6 = arith.constant 0 : index
    %c0_7 = arith.constant 0 : index
    %8 = vector.load %arg4[%c0_6, %c0_7] : memref<128x128xf32, #tpu.memory_space<vmem>>, vector<128x128xf32>
    %cst_8 = arith.constant dense<0.000000e+00> : vector<16x128xf32>
    %9 = tpu.matmul %7, %8, %cst_8 {dimension_numbers = #tpu.dot_dimension_numbers<[1], [0], [0], [1], [0, 0, 1, 1], [], []>} : vector<16x128xf32>, vector<128x128xf32>, vector<16x128xf32> -> vector<16x128xf32>
    %c0_9 = arith.constant 0 : index
    %c0_10 = arith.constant 0 : index
    %10 = vector.load %arg5[%c0_9, %c0_10] : memref<1x128xf32, #tpu.memory_space<vmem>>, vector<1x128xf32>
    %11 = vector.broadcast %10 : vector<1x128xf32> to vector<16x128xf32>
    %12 = arith.addf %9, %11 : vector<16x128xf32>
    %cst_11 = arith.constant 0.000000e+00 : f32
    %13 = vector.broadcast %cst_11 : f32 to vector<16x128xf32>
    %14 = arith.maximumf %12, %13 : vector<16x128xf32>
    %c0_12 = arith.constant 0 : index
    %c0_13 = arith.constant 0 : index
    %15 = vector.load %arg6[%c0_12, %c0_13] : memref<128x128xf32, #tpu.memory_space<vmem>>, vector<128x128xf32>
    %cst_14 = arith.constant dense<0.000000e+00> : vector<16x128xf32>
    %16 = tpu.matmul %14, %15, %cst_14 {dimension_numbers = #tpu.dot_dimension_numbers<[1], [0], [0], [1], [0, 0, 1, 1], [], []>} : vector<16x128xf32>, vector<128x128xf32>, vector<16x128xf32> -> vector<16x128xf32>
    %c0_15 = arith.constant 0 : index
    %c0_16 = arith.constant 0 : index
    %17 = vector.load %arg7[%c0_15, %c0_16] : memref<1x128xf32, #tpu.memory_space<vmem>>, vector<1x128xf32>
    %18 = vector.broadcast %17 : vector<1x128xf32> to vector<16x128xf32>
    %19 = arith.addf %16, %18 : vector<16x128xf32>
    %cst_17 = arith.constant 0.000000e+00 : f32
    %20 = vector.broadcast %cst_17 : f32 to vector<16x128xf32>
    %21 = arith.maximumf %19, %20 : vector<16x128xf32>
    %c0_18 = arith.constant 0 : index
    %c0_19 = arith.constant 0 : index
    %22 = vector.load %arg8[%c0_18, %c0_19] : memref<128x128xf32, #tpu.memory_space<vmem>>, vector<128x128xf32>
    %cst_20 = arith.constant dense<0.000000e+00> : vector<16x128xf32>
    %23 = tpu.matmul %21, %22, %cst_20 {dimension_numbers = #tpu.dot_dimension_numbers<[1], [0], [0], [1], [0, 0, 1, 1], [], []>} : vector<16x128xf32>, vector<128x128xf32>, vector<16x128xf32> -> vector<16x128xf32>
    %c0_21 = arith.constant 0 : index
    %c0_22 = arith.constant 0 : index
    %24 = vector.load %arg9[%c0_21, %c0_22] : memref<1x128xf32, #tpu.memory_space<vmem>>, vector<1x128xf32>
    %25 = vector.broadcast %24 : vector<1x128xf32> to vector<16x128xf32>
    %26 = arith.addf %23, %25 : vector<16x128xf32>
    %27 = vector.extract_strided_slice %26 {offsets = [0, 0], sizes = [16, 2], strides = [1, 1]} : vector<16x128xf32> to vector<16x2xf32>
    %c0_23 = arith.constant 0 : index
    %c0_24 = arith.constant 0 : index
    %28 = vector.load %arg10[%c0_23, %c0_24] : memref<16x2xf32, #tpu.memory_space<vmem>>, vector<16x2xf32>
    tpu.vector_store %arg10[%c0_23, %c0_24], %27 {strides = array<i32>} : memref<16x2xf32, #tpu.memory_space<vmem>>, vector<16x2xf32>,
    return
  }
  func.func @transform_0(%arg0: i32) -> (i32, i32) {
    %c0_i32 = arith.constant 0 : i32
    %c0_i32_0 = arith.constant 0 : i32
    return %arg0, %c0_i32 : i32, i32
  }
  func.func @transform_1(%arg0: i32) -> (i32, i32) {
    %c0_i32 = arith.constant 0 : i32
    %c0_i32_0 = arith.constant 0 : i32
    %c0_i32_1 = arith.constant 0 : i32
    return %c0_i32, %c0_i32_0 : i32, i32
  }
  func.func @transform_2(%arg0: i32) -> (i32, i32) {
    %c0_i32 = arith.constant 0 : i32
    %c0_i32_0 = arith.constant 0 : i32
    %c0_i32_1 = arith.constant 0 : i32
    return %c0_i32, %c0_i32_0 : i32, i32
  }
  func.func @transform_3(%arg0: i32) -> (i32, i32) {
    %c0_i32 = arith.constant 0 : i32
    %c0_i32_0 = arith.constant 0 : i32
    %c0_i32_1 = arith.constant 0 : i32
    return %c0_i32, %c0_i32_0 : i32, i32
  }
  func.func @transform_4(%arg0: i32) -> (i32, i32) {
    %c0_i32 = arith.constant 0 : i32
    %c0_i32_0 = arith.constant 0 : i32
    %c0_i32_1 = arith.constant 0 : i32
    return %c0_i32, %c0_i32_0 : i32, i32
  }
  func.func @transform_5(%arg0: i32) -> (i32, i32) {
    %c0_i32 = arith.constant 0 : i32
    %c0_i32_0 = arith.constant 0 : i32
    %c0_i32_1 = arith.constant 0 : i32
    return %c0_i32, %c0_i32_0 : i32, i32
  }
  func.func @transform_6(%arg0: i32) -> (i32, i32) {
    %c0_i32 = arith.constant 0 : i32
    %c0_i32_0 = arith.constant 0 : i32
    %c0_i32_1 = arith.constant 0 : i32
    return %c0_i32, %c0_i32_0 : i32, i32
  }
  func.func @transform_7(%arg0: i32) -> (i32, i32) {
    %c0_i32 = arith.constant 0 : i32
    %c0_i32_0 = arith.constant 0 : i32
    %c0_i32_1 = arith.constant 0 : i32
    return %c0_i32, %c0_i32_0 : i32, i32
  }
  func.func @transform_8(%arg0: i32) -> (i32, i32) {
    %c0_i32 = arith.constant 0 : i32
    %c0_i32_0 = arith.constant 0 : i32
    %c0_i32_1 = arith.constant 0 : i32
    return %c0_i32, %c0_i32_0 : i32, i32
  }
  func.func @transform_9(%arg0: i32) -> (i32, i32) {
    %c0_i32 = arith.constant 0 : i32
    %c0_i32_0 = arith.constant 0 : i32
    return %arg0, %c0_i32 : i32, i32
  }
}

</mosaic_0001>

<bundles_post_ra>
// kernel: tpu_custom_call.1
= control target key start
LH: loop header
LB: loop body
LE: loop exit
PB: predicated region body
PF: predicated region fallthrough
CT: control target
= control target key end

     0   :  { %14 = vsyncpa [#allocation3], 0  ;;  %s1344_s0 = inlined_call_operand.vmem [shape: f32[48,8], index: 0, kind: input, shape index: {}]   ;;  %s1345_s1 = inlined_call_operand.vmem [shape: f32[8,128], index: 1, kind: input, shape index: {}]   ;;  %s1346_s2 = inlined_call_operand.vmem [shape: f32[1,128], index: 2, kind: input, shape index: {}]   ;;  %s1347_s3 = inlined_call_operand.hbm [shape: f32[128,128], index: 3, kind: input, shape index: {}]   ;;  %s1348_s4 = inlined_call_operand.vmem [shape: f32[1,128], index: 4, kind: input, shape index: {}]   ;;  %s1349_s5 = inlined_call_operand.hbm [shape: f32[128,128], index: 5, kind: input, shape index: {}]   ;;  %s1350_s6 = inlined_call_operand.vmem [shape: f32[1,128], index: 6, kind: input, shape index: {}]   ;;  %s1351_s7 = inlined_call_operand.hbm [shape: f32[128,128], index: 7, kind: input, shape index: {}]   ;;  %s1352_s8 = inlined_call_operand.vmem [shape: f32[1,128], index: 8, kind: input, shape index: {}]   ;;  %s1353_s9 = inlined_call_operand.vmem [shape: f32[48,2], index: 9, kind: output, shape index: {}]  }
   0x1   :  { %15 = vsyncpa [#allocation5], 0  ;;  %s1242_s30 = smov 0  }
   0x2 LB: > { %s862_s10 = sadd.s32 4294967295, %s1185_s30   ;;  %p864_p0 = scmp.ge.s32.totalorder %s1185_s30, 1  ;;  %s1185_s30 = sphi %s1242_s30, %s21_s30  }
   0x3   : > { %p246_p1 = scmp.lt.s32.totalorder %s1185_s30, 4  ;;  %p1252_p2 = scmp.eq.s32.totalorder %s862_s10, 0 }
   0x4   : > { %s1187_s13 = smov [#allocation4]   ;;  %s1188_s15 = smov [#allocation2]  }
   0x5   : > { %p1256_p3 = pnand %p864_p0, %p246_p1  ;;  %s280_s14 = sshll.u32 %s1187_s13, 4  ;;  %s281_s14 = int_to_ptr.vmem [resolvable:$true] %s280_s14 }
   0x6   : > { %s264_s16 = sshll.u32 %s1188_s15, 4  ;;  %s1189_s18 = smov [#allocation6]   ;;  %s265_s16 = int_to_ptr.vmem [resolvable:$true] %s264_s16 }
   0x7   : > { %p1064_p4 = pneg %p1256_p3  ;;  %s296_s19 = sshll.u32 %s1189_s18, 4  ;;  %s1268_s19 = int_to_ptr.vmem [resolvable:$true] %s296_s19 }
   0x8   : > { %s1104_s20 = scalar_lea.vmem %s281_s14, 2048  ;;  %p1112_p10 = scmp.lt.s32.totalorder %s281_s14, %s281_s14 }
   0x9   : > { %p1264_p5 = pnand %p1252_p2, %p1064_p4  ;;  %p1105_p7 = scmp.ne.s32.totalorder %s281_s14, %s1104_s20 }
   0xa   : > { %p1113_p11 = scmp.lt.s32.totalorder %s1104_s20, %s1104_s20 }
   0xb   : > { %p1095_p6 = pneg %p1264_p5 }
   0xc   : > { %p1114_p12 = por %p1113_p11, %p1112_p10 }
   0xd   : > { %p1107_p8 = pnand %p1105_p7, %p1095_p6 }
   0xf   : > { %p1108_p9 = pneg %p1107_p8 }
  0x11   : > { %p1115_p13 = pnand %p1114_p12, %p1108_p9 }
  0x13   : > { %1118 = shalt.err (!%p1115_p13)
}
  0x14   : > { %s1190_s21 = smov 128   ;;  %s1191_s22 = smov 8  }
  0x15   : > { %1070 = dma.hbm_to_vmem [thread:$0]  (!%p1264_p5), %s1349_s5, 2048, %s281_s14, [#allocation5], %s1190_s21, %s1190_s21, %s1191_s22  }
  0x16   : > { %s1130_s25 = scalar_lea.vmem %s265_s16, 2048  ;;  %p1138_p7 = scmp.lt.s32.totalorder %s265_s16, %s265_s16 }
  0x17   : > { %p1131_p0 = scmp.ne.s32.totalorder %s265_s16, %s1130_s25  ;;  %p1139_p8 = scmp.lt.s32.totalorder %s1130_s25, %s1130_s25 }
  0x19   : > { %p1133_p1 = pnand %p1131_p0, %p1095_p6  ;;  %p1140_p10 = por %p1139_p8, %p1138_p7 }
  0x1b   : > { %p1134_p4 = pneg %p1133_p1 }
  0x1d   : > { %p1141_p9 = pnand %p1140_p10, %p1134_p4 }
  0x1f   : > { %1144 = shalt.err (!%p1141_p9)
}
  0x20   : > { %1067 = dma.hbm_to_vmem [thread:$0]  (!%p1264_p5), %s1347_s3, 2048, %s265_s16, [#allocation3], %s1190_s21, %s1190_s21, %s1191_s22  }
  0x21   : > { %s1156_s28 = scalar_lea.vmem %s1268_s19, 2048  ;;  %p1164_p0 = scmp.lt.s32.totalorder %s1268_s19, %s1268_s19 }
  0x22   : > { %p1157_p11 = scmp.ne.s32.totalorder %s1268_s19, %s1156_s28  ;;  %p1165_p1 = scmp.lt.s32.totalorder %s1156_s28, %s1156_s28 }
  0x24   : > { %p1159_p12 = pnand %p1157_p11, %p1095_p6  ;;  %p1166_p4 = por %p1165_p1, %p1164_p0 }
  0x26   : > { %p1160_p13 = pneg %p1159_p12 }
  0x28   : > { %p1167_p7 = pnand %p1166_p4, %p1160_p13 }
  0x2a   : > { %1170 = shalt.err (!%p1167_p7)
}
  0x2b   : > { %1073 = dma.hbm_to_vmem [thread:$0]  (!%p1264_p5), %s1351_s7, 2048, %s1268_s19, [#allocation5], %s1190_s21, %s1190_s21, %s1191_s22  }
  0x2c   : > { %324 = sbr.rel (%p1256_p3) target bundleno = 858 (0x35a), region = 56 }
  0x31   : > { %1176 = dma.done.wait (%p1252_p2), [#allocation3], 2048  }
  0x32   : > { %1178 = vsyncadd (%p1252_p2), [#allocation3], 4294965248 }
  0x33   : > { %1180 = dma.done.wait (%p1252_p2), [#allocation5], 4096  }
  0x34   : > { %1182 = vsyncadd (%p1252_p2), [#allocation5], 4294963200  ;;  %s873_s14 = sshll.u32 %s862_s10, 1  ;;  %vm390_vm0 = vcmask 64512   ;;  %v382_v0 = vld [vmem:[%s1345_s1] sm:$0xff]  ;;  %v489_v3 = vld [vmem:[#allocation2 + $0x78] sm:$0xff] }
  0x35   : > { %p369_p6 = scmp.lt.s32.totalorder %s873_s14, 5  ;;  %942 = vmatprep.subr.mxu0 %v382_v0  ;;  %v488_v4 = vld [vmem:[#allocation2 + $0x70] sm:$0xff]  ;;  %947 = vmatprep.subr.mxu1 %v489_v3  ;;  %v487_v5 = vld [vmem:[#allocation2 + $0x68] sm:$0xff]  ;;  %v486_v6 = vld [vmem:[#allocation2 + $0x60] sm:$0xff]  ;;  %vm772_vm1 = vcmask 15360  }
  0x36   : > { %943 = vmatpush3.msra.mxu0 %v382_v0  ;;  %948 = vmatpush3.msra.mxu1 %v489_v3  ;;  %v485_v7 = vld [vmem:[#allocation2 + $0x58] sm:$0xff]  ;;  %v484_v8 = vld [vmem:[#allocation2 + $0x50] sm:$0xff]  ;;  %v483_v9 = vld [vmem:[#allocation2 + $0x48] sm:$0xff] }
  0x37   : > { %s1358_s14 = smov (!%p369_p6, %s873_s14), 5  ;;  %949 = vmatprep.subr.mxu1 %v488_v4  ;;  %v482_v10 = vld [vmem:[#allocation2 + $0x40] sm:$0xff]  ;;  %v481_v11 = vld [vmem:[#allocation2 + $0x38] sm:$0xff]  ;;  %v480_v12 = vld [vmem:[#allocation2 + $0x30] sm:$0xff] }
  0x38   : > { %s874_s12 = sshll.u32 %s1358_s14, 3  ;;  %950 = vmatpush3.msra.mxu1 %v488_v4  ;;  %v479_v13 = vld [vmem:[#allocation2 + $0x28] sm:$0xff]  ;;  %v478_v14 = vld [vmem:[#allocation2 + $0x20] sm:$0xff]  ;;  %v477_v15 = vld [vmem:[#allocation2 + $0x18] sm:$0xff] }
  0x39   : > { %s372_s17 = scalar_lea.vmem %s1344_s0, %s874_s12  ;;  %951 = vmatprep.subr.mxu1 %v487_v5  ;;  %v476_v16 = vld [vmem:[#allocation2 + $0x10] sm:$0xff]  ;;  %v475_v17 = vld [vmem:[#allocation2 + $0x8] sm:$0xff]  ;;  %v474_v18 = vld [vmem:[#allocation2] sm:$0xff]  ;;  %s378_s28 = scalar_lea.vmem %s1353_s9, %s874_s12 }
  0x3a   : > { %v380_v1 = vld [vmem:[%s372_s17] sm:$0xff]  ;;  %v381_v2 = vld [vmem:[%s372_s17 + $0x8] sm:$0xff]  ;;  %952 = vmatpush3.msra.mxu1 %v487_v5  ;;  %v589_v19 = vld [vmem:[#allocation4 + $0x78] sm:$0xff] }
  0x3b   : > { %944 = vmatprep.mubr.msk.f32.mxu0 %vm390_vm0, %v380_v1  ;;  %953 = vmatprep.subr.mxu1 %v486_v6  ;;  %v588_v20 = vld [vmem:[#allocation4 + $0x70] sm:$0xff]  ;;  %v587_v21 = vld [vmem:[#allocation4 + $0x68] sm:$0xff]  ;;  %v586_v22 = vld [vmem:[#allocation4 + $0x60] sm:$0xff] }
  0x3c   : > { %945 = vmatmul.mubr.msk.f32.vlgmr.msra.gmra.mxu0 %vm390_vm0, %v381_v2  ;;  %954 = vmatpush3.msra.mxu1 %v486_v6  ;;  %v585_v23 = vld [vmem:[#allocation4 + $0x58] sm:$0xff]  ;;  %v584_v24 = vld [vmem:[#allocation4 + $0x50] sm:$0xff]  ;;  %v583_v25 = vld [vmem:[#allocation4 + $0x48] sm:$0xff] }
  0x3d   : > { %955 = vmatprep.subr.mxu1 %v485_v7  ;;  %982 = vmatprep.subr.mxu0 %v589_v19  ;;  %v582_v26 = vld [vmem:[#allocation4 + $0x40] sm:$0xff]  ;;  %v581_v27 = vld [vmem:[#allocation4 + $0x38] sm:$0xff]  ;;  %v580_v28 = vld [vmem:[#allocation4 + $0x30] sm:$0xff] }
  0x3e   : > { %956 = vmatpush3.msra.mxu1 %v485_v7  ;;  %983 = vmatpush3.msra.mxu0 %v589_v19  ;;  %v579_v29 = vld [vmem:[#allocation4 + $0x28] sm:$0xff]  ;;  %v578_v30 = vld [vmem:[#allocation4 + $0x20] sm:$0xff]  ;;  %v577_v38 = vld [vmem:[#allocation4 + $0x18] sm:$0xff] }
  0x3f   : > { %957 = vmatprep.subr.mxu1 %v484_v8  ;;  %984 = vmatprep.subr.mxu0 %v588_v20  ;;  %v877_v31 = vld [vmem:[%s1346_s2] ss:$0 sm:$0xff]  ;;  %v576_v39 = vld [vmem:[#allocation4 + $0x10] sm:$0xff]  ;;  %v575_v40 = vld [vmem:[#allocation4 + $0x8] sm:$0xff] }
  0x40   : > { %958 = vmatpush3.msra.mxu1 %v484_v8  ;;  %985 = vmatpush3.msra.mxu0 %v588_v20  ;;  %v574_v41 = vld [vmem:[#allocation4] sm:$0xff]  ;;  %v689_v42 = vld [vmem:[#allocation6 + $0x78] sm:$0xff]  ;;  %v688_v43 = vld [vmem:[#allocation6 + $0x70] sm:$0xff] }
  0x41   : > { %959 = vmatprep.subr.mxu1 %v483_v9  ;;  %986 = vmatprep.subr.mxu0 %v587_v21  ;;  %v687_v44 = vld [vmem:[#allocation6 + $0x68] sm:$0xff]  ;;  %v686_v45 = vld [vmem:[#allocation6 + $0x60] sm:$0xff]  ;;  %v685_v46 = vld [vmem:[#allocation6 + $0x58] sm:$0xff] }
  0x42   : > { %960 = vmatpush3.msra.mxu1 %v483_v9  ;;  %987 = vmatpush3.msra.mxu0 %v587_v21  ;;  %v684_v47 = vld [vmem:[#allocation6 + $0x50] sm:$0xff]  ;;  %v683_v48 = vld [vmem:[#allocation6 + $0x48] sm:$0xff]  ;;  %v682_v49 = vld [vmem:[#allocation6 + $0x40] sm:$0xff] }
  0x43   : > { %961 = vmatprep.subr.mxu1 %v482_v10  ;;  %988 = vmatprep.subr.mxu0 %v586_v22  ;;  %v681_v50 = vld [vmem:[#allocation6 + $0x38] sm:$0xff]  ;;  %v680_v51 = vld [vmem:[#allocation6 + $0x30] sm:$0xff]  ;;  %v679_v52 = vld [vmem:[#allocation6 + $0x28] sm:$0xff] }
  0x44   : > { %962 = vmatpush3.msra.mxu1 %v482_v10  ;;  %989 = vmatpush3.msra.mxu0 %v586_v22  ;;  %v678_v53 = vld [vmem:[#allocation6 + $0x20] sm:$0xff]  ;;  %v677_v61 = vld [vmem:[#allocation6 + $0x18] sm:$0xff]  ;;  %v676_v62 = vld [vmem:[#allocation6 + $0x10] sm:$0xff] }
  0x45   : > { %963 = vmatprep.subr.mxu1 %v481_v11  ;;  %990 = vmatprep.subr.mxu0 %v585_v23  ;;  %v880_v54 = vld [vmem:[%s1348_s4] ss:$0 sm:$0xff]  ;;  %v675_v63 = vld [vmem:[#allocation6 + $0x8] sm:$0xff] }
  0x46   : > { %964 = vmatpush3.msra.mxu1 %v481_v11  ;;  %991 = vmatpush3.msra.mxu0 %v585_v23  ;;  %v674_v0 = vld [vmem:[#allocation6] sm:$0xff] }
  0x47   : > { %965 = vmatprep.subr.mxu1 %v480_v12  ;;  %992 = vmatprep.subr.mxu0 %v584_v24  ;;  %v881_v1 = vld [vmem:[%s1350_s6] ss:$0 sm:$0xff] }
  0x48   : > { %966 = vmatpush3.msra.mxu1 %v480_v12  ;;  %993 = vmatpush3.msra.mxu0 %v584_v24  ;;  %v882_v9 = vld [vmem:[%s1352_s8] ss:$0 sm:$0xff] }
  0x49   : > { %967 = vmatprep.subr.mxu1 %v479_v13  ;;  %994 = vmatprep.subr.mxu0 %v583_v25 }
  0x4a   : > { %968 = vmatpush3.msra.mxu1 %v479_v13  ;;  %995 = vmatpush3.msra.mxu0 %v583_v25 }
  0x4b   : > { %969 = vmatprep.subr.mxu1 %v478_v14  ;;  %996 = vmatprep.subr.mxu0 %v582_v26 }
  0x4c   : > { %970 = vmatpush3.msra.mxu1 %v478_v14  ;;  %997 = vmatpush3.msra.mxu0 %v582_v26 }
  0x4d   : > { %971 = vmatprep.subr.mxu1 %v477_v15  ;;  %998 = vmatprep.subr.mxu0 %v581_v27 }
  0x4e   : > { %972 = vmatpush3.msra.mxu1 %v477_v15  ;;  %999 = vmatpush3.msra.mxu0 %v581_v27 }
  0x4f   : > { %973 = vmatprep.subr.mxu1 %v476_v16  ;;  %1000 = vmatprep.subr.mxu0 %v580_v28 }
  0x50   : > { %974 = vmatpush3.msra.mxu1 %v476_v16  ;;  %1001 = vmatpush3.msra.mxu0 %v580_v28 }
  0x51   : > { %975 = vmatprep.subr.mxu1 %v475_v17  ;;  %1002 = vmatprep.subr.mxu0 %v579_v29 }
  0x52   : > { %976 = vmatpush3.msra.mxu1 %v475_v17  ;;  %1003 = vmatpush3.msra.mxu0 %v579_v29 }
  0x53   : > { %977 = vmatprep.subr.mxu1 %v474_v18  ;;  %1004 = vmatprep.subr.mxu0 %v578_v30 }
  0x54   : > { %978 = vmatpush3.msra.mxu1 %v474_v18  ;;  %1005 = vmatpush3.msra.mxu0 %v578_v30 }
  0x55   : > { %1006 = vmatprep.subr.mxu0 %v577_v38  ;;  %1017 = vmatprep.subr.mxu1 %v689_v42 }
  0x56   : > { %1007 = vmatpush3.msra.mxu0 %v577_v38 }
  0x57   : > { %1008 = vmatprep.subr.mxu0 %v576_v39 }
  0x58   : > { %1009 = vmatpush3.msra.mxu0 %v576_v39 }
  0x59   : > { %1010 = vmatprep.subr.mxu0 %v575_v40 }
  0x5a   : > { %1011 = vmatpush3.msra.mxu0 %v575_v40 }
  0x5b   : > { %1012 = vmatprep.subr.mxu0 %v574_v41 }
  0x5c   : > { %1013 = vmatpush3.msra.mxu0 %v574_v41 }
  0xfc   : > { %v946_v32 = vpop.f32.mrf.mxu0 }
  0xfd   : > { %v469_v33 = vadd.f32 %v946_v32, %v877_v31 }
  0xfe   : > { %v463_v34 = vpop.f32.mrf.mxu0 }
  0xff   : > { %v464_v35 = vadd.f32 %v877_v31, %v463_v34  ;;  %v473_v37 = vmax.f32 %v469_v33, 0.0 }
 0x101   : > { %v472_v36 = vmax.f32 %v464_v35, 0.0 }
 0x103   : > { %979 = vmatprep.mubr.f32.mxu1 %v472_v36 }
 0x104   : > { %980 = vmatmul.mubr.f32.vlgmr.msra.gmra.mxu1 %v473_v37 }
 0x105   : > { %1018 = vmatpush3.msra.mxu1 %v689_v42 }
 0x106   : > { %1019 = vmatprep.subr.mxu1 %v688_v43 }
 0x107   : > { %1020 = vmatpush3.msra.mxu1 %v688_v43 }
 0x108   : > { %1021 = vmatprep.subr.mxu1 %v687_v44 }
 0x109   : > { %1022 = vmatpush3.msra.mxu1 %v687_v44 }
 0x10a   : > { %1023 = vmatprep.subr.mxu1 %v686_v45 }
 0x10b   : > { %1024 = vmatpush3.msra.mxu1 %v686_v45 }
 0x10c   : > { %1025 = vmatprep.subr.mxu1 %v685_v46 }
 0x10d   : > { %1026 = vmatpush3.msra.mxu1 %v685_v46 }
 0x10e   : > { %1027 = vmatprep.subr.mxu1 %v684_v47 }
 0x10f   : > { %1028 = vmatpush3.msra.mxu1 %v684_v47 }
 0x110   : > { %1029 = vmatprep.subr.mxu1 %v683_v48 }
 0x111   : > { %1030 = vmatpush3.msra.mxu1 %v683_v48 }
 0x112   : > { %1031 = vmatprep.subr.mxu1 %v682_v49 }
 0x113   : > { %1032 = vmatpush3.msra.mxu1 %v682_v49 }
 0x114   : > { %1033 = vmatprep.subr.mxu1 %v681_v50 }
 0x115   : > { %1034 = vmatpush3.msra.mxu1 %v681_v50 }
 0x116   : > { %1035 = vmatprep.subr.mxu1 %v680_v51 }
 0x117   : > { %1036 = vmatpush3.msra.mxu1 %v680_v51 }
 0x118   : > { %1037 = vmatprep.subr.mxu1 %v679_v52 }
 0x119   : > { %1038 = vmatpush3.msra.mxu1 %v679_v52 }
 0x11a   : > { %1039 = vmatprep.subr.mxu1 %v678_v53 }
 0x11b   : > { %1040 = vmatpush3.msra.mxu1 %v678_v53 }
 0x11c   : > { %1041 = vmatprep.subr.mxu1 %v677_v61 }
 0x11d   : > { %1042 = vmatpush3.msra.mxu1 %v677_v61 }
 0x11e   : > { %1043 = vmatprep.subr.mxu1 %v676_v62 }
 0x11f   : > { %1044 = vmatpush3.msra.mxu1 %v676_v62 }
 0x120   : > { %1045 = vmatprep.subr.mxu1 %v675_v63 }
 0x121   : > { %1046 = vmatpush3.msra.mxu1 %v675_v63 }
 0x122   : > { %1047 = vmatprep.subr.mxu1 %v674_v0 }
 0x123   : > { %1048 = vmatpush3.msra.mxu1 %v674_v0 }
 0x1c4   : > { %v981_v55 = vpop.f32.mrf.mxu1 }
 0x1c5   : > { %v569_v56 = vadd.f32 %v981_v55, %v880_v54 }
 0x1c6   : > { %v563_v57 = vpop.f32.mrf.mxu1 }
 0x1c7   : > { %v564_v58 = vadd.f32 %v880_v54, %v563_v57  ;;  %v573_v60 = vmax.f32 %v569_v56, 0.0 }
 0x1c9   : > { %v572_v59 = vmax.f32 %v564_v58, 0.0 }
 0x1cb   : > { %1014 = vmatprep.mubr.f32.mxu0 %v572_v59 }
 0x1cc   : > { %1015 = vmatmul.mubr.f32.vlgmr.msra.gmra.mxu0 %v573_v60 }
 0x28c   : > { %v1016_v2 = vpop.f32.mrf.mxu0 }
 0x28d   : > { %v669_v3 = vadd.f32 %v1016_v2, %v881_v1 }
 0x28e   : > { %v663_v4 = vpop.f32.mrf.mxu0 }
 0x28f   : > { %v664_v5 = vadd.f32 %v881_v1, %v663_v4  ;;  %v673_v7 = vmax.f32 %v669_v3, 0.0 }
 0x291   : > { %v672_v6 = vmax.f32 %v664_v5, 0.0 }
 0x293   : > { %1049 = vmatprep.mubr.f32.mxu1 %v672_v6 }
 0x294   : > { %1050 = vmatmul.mubr.f32.vlgmr.msra.gmra.mxu1 %v673_v7 }
 0x354   : > { %v1051_v8 = vpop.f32.mrf.mxu1 }
 0x355   : > { %v769_v12 = vadd.f32 %v1051_v8, %v882_v9 }
 0x356   : > { %v763_v10 = vpop.f32.mrf.mxu1 }
 0x357   : > { %v764_v11 = vadd.f32 %v882_v9, %v763_v10  ;;  %774 = vst.msk [vmem:[%s378_s28 + $0x8] sm:$0xff] %vm772_vm1, %v769_v12 }
 0x359   : > { %773 = vst.msk [vmem:[%s378_s28] sm:$0xff] %vm772_vm1, %v764_v11 }
 0x35a PF: > { %s21_s30 = sadd.s32 1, %s1185_s30  }
 0x35b   : > { %p18_p2 = scmp.ge.s32.totalorder %s21_s30, 5  }
 0x35d   :  { %20 = sbr.rel (!%p18_p2) target bundleno = 2 (0x2), region = 99 }
 0x362   :  { %797 = vsyncpa [#allocation3], 1 }
 0x363   :  { %799 = vsyncpa [#allocation3 + $0x1], 1 }
 0x364   :  { %800 = vsyncpa [#allocation5], 1 }

</bundles_post_ra>
